<compile_context>
chip_gen: v6e
topology: v6e:2x2x1
jax: 0.10.0
libtpu: 0.0.40
codegen_flags: <defaults>
</compile_context>

<pallas_src>
import jax
import jax.numpy as jnp
from jax import lax
from jax.experimental import pallas as pl
from jax.experimental.pallas import tpu as pltpu

HIGH = jax.lax.Precision.HIGHEST  # used only by the pure-JAX reference


def _round_up(x, m):
    return (x + m - 1) // m * m


def attention_block_forward(x, params, *, tq=256):
    """x: (B, C, H, W) float32 (NCHW, like PyTorch). Returns (B, C, H, W) float32."""
    wt, wp, wg, wo, gamma = params
    B, C, H, W = x.shape
    assert H % 2 == 0 and W % 2 == 0, "max_pool2d(kernel_size=2) requires even H, W"
    HW = H * W
    C8, C2 = C // 8, C // 2
    C8p, C2p = _round_up(C8, 128), _round_up(C2, 128)   # lane-dense (128-aligned) widths

    TQ = tq if (tq <= HW and HW % tq == 0) else HW      # query-tile size
    QT = HW // TQ

    # ---------------- layout prep (plain-JAX glue) ----------------
    x_s = jnp.transpose(x.reshape(B, C, HW), (0, 2, 1))              # (B, HW, C) f32

    # Four corners of every 2x2 pooling window, pooled row-major spatial order,
    # stacked into a single input (one DMA stream), channels-last, bf16.
    xw = x.reshape(B, C, H // 2, 2, W // 2, 2)
    corners = jnp.stack(
        [xw[:, :, :, 0, :, 0], xw[:, :, :, 0, :, 1],
         xw[:, :, :, 1, :, 0], xw[:, :, :, 1, :, 1]], axis=1)        # (B, 4, C, H/2, W/2)
    corners = jnp.transpose(corners.reshape(B, 4, C, HW // 4),
                            (0, 1, 3, 2)).astype(jnp.bfloat16)       # (B, 4, HW/4, C)

    def pad_cols(w_t, width):
        return jnp.pad(w_t, ((0, 0), (0, width - w_t.shape[1])))

    wt_p = pad_cols(wt.T, C8p).astype(jnp.bfloat16)                  # (C, C8p)
    wpg = jnp.concatenate([pad_cols(wp.T, C8p),                      # fused phi|g weight
                           pad_cols(wg.T, C2p)], axis=1).astype(jnp.bfloat16)  # (C, C8p+C2p)
    wo_p = jnp.pad(wo.T, ((0, C2p - C2), (0, 0))).astype(jnp.bfloat16)          # (C2p, C)
    gamma_arr = jnp.asarray(gamma, jnp.float32).reshape(1, 1)

    # ---------------- kernel ----------------
    def kernel(x_ref, c4_ref, wt_ref, wpg_ref, wo_ref, gamma_ref, out_ref, pg_ref):
        q = pl.program_id(1)

        # phi|g = maxpool2(1x1conv(x)), computed once per image and kept resident
        # in VMEM scratch for all query tiles of that image.
        @pl.when(q == 0)
        def _():
            w = wpg_ref[...]                                          # (C, C8p+C2p) bf16
            p0 = jnp.dot(c4_ref[0, 0], w, preferred_element_type=jnp.float32)
            p1 = jnp.dot(c4_ref[0, 1], w, preferred_element_type=jnp.float32)
            p2 = jnp.dot(c4_ref[0, 2], w, preferred_element_type=jnp.float32)
            p3 = jnp.dot(c4_ref[0, 3], w, preferred_element_type=jnp.float32)
            pg_ref[...] = jnp.maximum(jnp.maximum(p0, p1),
                                      jnp.maximum(p2, p3)).astype(jnp.bfloat16)

        x_blk = x_ref[0]                                              # (TQ, C) f32
        xb = x_blk.astype(jnp.bfloat16)

        # theta = 1x1 conv (C -> C8, zero-padded to C8p)
        theta = jnp.dot(xb, wt_ref[...],
                        preferred_element_type=jnp.float32)           # (TQ, C8p)

        # logits = theta @ phi^T  (padded columns are zero -> exact)
        logits = lax.dot_general(theta.astype(jnp.bfloat16), pg_ref[:, :C8p],
                                 (((1,), (1,)), ((), ())),
                                 preferred_element_type=jnp.float32)  # (TQ, HW/4)

        # Softmax over pooled axis, normalization deferred to the narrow result.
        m = jnp.max(logits, axis=-1, keepdims=True)
        e = jnp.exp(logits - m)
        s = jnp.sum(e, axis=-1, keepdims=True)

        attn = jnp.dot(e.astype(jnp.bfloat16), pg_ref[:, C8p:],
                       preferred_element_type=jnp.float32)            # (TQ, C2p)
        attn = attn * pl.reciprocal(s, approx=True)

        # o = 1x1 conv (C2 -> C); padded rows of wo are zero -> exact.
        o = jnp.dot(attn.astype(jnp.bfloat16), wo_ref[...],
                    preferred_element_type=jnp.float32)               # (TQ, C)

        out_ref[0] = gamma_ref[0, 0] * o + x_blk

    # VMEM budget: double-buffered I/O tiles + resident corners/weights/scratch
    # + softmax temporaries, with headroom.
    vmem_bytes = (
        2 * 2 * TQ * C * 4                                    # x / out tiles (f32, 2-buf)
        + 2 * 4 * (HW // 4) * C * 2                           # stacked corners (bf16, 2-buf)
        + 2 * (C * C8p + C * (C8p + C2p) + C2p * C) * 2       # weights (bf16, 2-buf)
        + (HW // 4) * (C8p + C2p) * 2                         # phi|g scratch (bf16)
        + 2 * TQ * (HW // 4) * 4                              # logits / exp temps (f32)
    )
    vmem_limit = int(min(110 * 2**20, max(32 * 2**20, 2 * vmem_bytes)))

    out_s = pl.pallas_call(
        kernel,
        out_shape=jax.ShapeDtypeStruct((B, HW, C), jnp.float32),
        grid_spec=pltpu.PrefetchScalarGridSpec(
            num_scalar_prefetch=0,
            grid=(B, QT),
            in_specs=[
                pl.BlockSpec((1, TQ, C), lambda b, q: (b, q, 0)),             # x
                pl.BlockSpec((1, 4, HW // 4, C), lambda b, q: (b, 0, 0, 0)),  # corners
                pl.BlockSpec((C, C8p), lambda b, q: (0, 0)),                  # W_theta^T
                pl.BlockSpec((C, C8p + C2p), lambda b, q: (0, 0)),            # [W_phi|W_g]^T
                pl.BlockSpec((C2p, C), lambda b, q: (0, 0)),                  # W_o^T
                pl.BlockSpec(memory_space=pltpu.MemorySpace.SMEM),            # gamma
            ],
            out_specs=pl.BlockSpec((1, TQ, C), lambda b, q: (b, q, 0)),
            scratch_shapes=[pltpu.VMEM((HW // 4, C8p + C2p), jnp.bfloat16)],  # phi|g
        ),
        compiler_params=pltpu.CompilerParams(
            # q axis is sequential (phi|g scratch persists across it); the batch
            # axis is parallel so v7x's two TensorCores split the images.
            dimension_semantics=("parallel", "arbitrary"),
            vmem_limit_bytes=vmem_limit,
        ),
    )(x_s, corners, wt_p, wpg, wo_p, gamma_arr)

    return jnp.transpose(out_s, (0, 2, 1)).reshape(B, C, H, W)


def init_params(key, channels):
    """Deterministic init. Conv2d(k=1, bias=False) weights, spectral-normalized
    once here in plain JAX (largest singular value)."""
    C = channels
    k1, k2, k3, k4 = jax.random.split(key, 4)

    def sn_weight(k, out_c, in_c):
        w = jax.random.normal(k, (out_c, in_c), jnp.float32) * 0.1
        sigma = jnp.linalg.norm(w, ord=2)
        return w / sigma

    wt = sn_weight(k1, C // 8, C)
    wp = sn_weight(k2, C // 8, C)
    wg = sn_weight(k3, C // 2, C)
    wo = sn_weight(k4, C, C // 2)
    gamma = jnp.float32(0.0)                     # matches nn.Parameter(torch.tensor(0.0))
    return wt, wp, wg, wo, gamma


def reference_forward(x, params):
    """Pure-JAX (f32, HIGHEST precision) reference of the PyTorch forward (NCHW)."""
    wt, wp, wg, wo, gamma = params
    B, C, H, W = x.shape
    HW = H * W
    xf = x.reshape(B, C, HW)
    theta = jnp.einsum('oc,bcs->bos', wt, xf, precision=HIGH)
    phi = jnp.einsum('oc,bcs->bos', wp, xf, precision=HIGH).reshape(B, C // 8, H, W)
    g = jnp.einsum('oc,bcs->bos', wg, xf, precision=HIGH).reshape(B, C // 2, H, W)

    def pool(a):
        return a.reshape(a.shape[0], a.shape[1], H // 2, 2, W // 2, 2).max(axis=(3, 5))

    phi = pool(phi).reshape(B, C // 8, HW // 4)
    g = pool(g).reshape(B, C // 2, HW // 4)
    logits = jnp.einsum('bcs,bct->bst', theta, phi, precision=HIGH)
    beta = jax.nn.softmax(logits, axis=-1)
    o_in = jnp.einsum('bct,bst->bcs', g, beta, precision=HIGH)        # g @ beta^T
    o = jnp.einsum('oc,bcs->bos', wo, o_in, precision=HIGH)
    return (gamma * o + xf).reshape(B, C, H, W)


if __name__ == "__main__":
    key = jax.random.PRNGKey(0)
    kx, kp = jax.random.split(key)

    B, C, H, W = 2, 32, 16, 16
    x = jax.random.normal(kx, (B, C, H, W), jnp.float32)
    params = init_params(kp, C)

    # gamma == 0.0 (as in __init__): output must equal x (residual kept in f32).
    out = jax.block_until_ready(attention_block_forward(x, params, tq=128))
    ref = reference_forward(x, params)
    assert out.shape == (B, C, H, W)
    assert jnp.allclose(out, ref, atol=1e-5, rtol=1e-5)

    # Non-trivial path: same weights, gamma = 1.0.  Kernel matmuls are bf16 with
    # f32 accumulation, so compare against the f32 reference with a bf16-level
    # tolerance.
    wt, wp, wg, wo, _ = params
    params_nz = (wt, wp, wg, wo, jnp.float32(1.0))
    out_nz = jax.block_until_ready(attention_block_forward(x, params_nz, tq=128))
    ref_nz = reference_forward(x, params_nz)
    assert jnp.allclose(out_nz, ref_nz, atol=8e-2, rtol=8e-2)

    print("KERNEL_OK")
</pallas_src>

<mosaic_0001>
module attributes {stable_mosaic.version = 11 : i64} {
  func.func @kernel(%arg0: i32, %arg1: i32, %arg2: memref<1x128x32xf32, #tpu.memory_space<vmem>>, %arg3: memref<1x4x64x32xbf16, #tpu.memory_space<vmem>>, %arg4: memref<32x128xbf16, #tpu.memory_space<vmem>>, %arg5: memref<32x256xbf16, #tpu.memory_space<vmem>>, %arg6: memref<128x32xbf16, #tpu.memory_space<vmem>>, %arg7: memref<1x1xf32, #tpu.memory_space<smem>>, %arg8: memref<1x128x32xf32, #tpu.memory_space<vmem>>, %arg9: memref<64x256xbf16, #tpu.memory_space<vmem>>) attributes {dimension_semantics = [#tpu.dimension_semantics<parallel>, #tpu.dimension_semantics<arbitrary>], iteration_bounds = array<i64: 2, 2>, scalar_prefetch = 0 : i64, scratch_operands = 1 : i64, tpu.core_type = #tpu.core_type<tc>, window_params = [{transform_indices = @transform_0, window_bounds = array<i64: 1, 128, 32>}, {transform_indices = @transform_1, window_bounds = array<i64: 1, 4, 64, 32>}, {pipeline_mode = #tpu.pipeline_mode<synchronous>, transform_indices = @transform_2, window_bounds = array<i64: 32, 128>}, {pipeline_mode = #tpu.pipeline_mode<synchronous>, transform_indices = @transform_3, window_bounds = array<i64: 32, 256>}, {pipeline_mode = #tpu.pipeline_mode<synchronous>, transform_indices = @transform_4, window_bounds = array<i64: 128, 32>}, {transform_indices = @transform_5, window_bounds = array<i64: 1, 1>}, {transform_indices = @transform_6, window_bounds = array<i64: 1, 128, 32>}]} {
    %c0_i32 = arith.constant 0 : i32
    %0 = arith.cmpi eq, %arg1, %c0_i32 : i32
    %1 = arith.extui %0 : i1 to i32
    %c0_i32_0 = arith.constant 0 : i32
    %2 = arith.cmpi ne, %1, %c0_i32_0 : i32
    scf.if %2 {
      %c0_20 = arith.constant 0 : index
      %c0_21 = arith.constant 0 : index
      %34 = vector.load %arg5[%c0_20, %c0_21] : memref<32x256xbf16, #tpu.memory_space<vmem>>, vector<32x256xbf16>
      %c0_22 = arith.constant 0 : index
      %c0_23 = arith.constant 0 : index
      %c0_24 = arith.constant 0 : index
      %c0_25 = arith.constant 0 : index
      %35 = vector.load %arg3[%c0_22, %c0_23, %c0_24, %c0_25] : memref<1x4x64x32xbf16, #tpu.memory_space<vmem>>, vector<1x1x64x32xbf16>
      %36 = vector.shape_cast %35 : vector<1x1x64x32xbf16> to vector<64x32xbf16>
      %cst_26 = arith.constant dense<0.000000e+00> : vector<64x256xf32>
      %37 = tpu.matmul %36, %34, %cst_26 {dimension_numbers = #tpu.dot_dimension_numbers<[1], [0], [0], [1], [0, 0, 1, 1], [], []>} : vector<64x32xbf16>, vector<32x256xbf16>, vector<64x256xf32> -> vector<64x256xf32>
      %c0_27 = arith.constant 0 : index
      %c1 = arith.constant 1 : index
      %c0_28 = arith.constant 0 : index
      %c0_29 = arith.constant 0 : index
      %38 = vector.load %arg3[%c0_27, %c1, %c0_28, %c0_29] : memref<1x4x64x32xbf16, #tpu.memory_space<vmem>>, vector<1x1x64x32xbf16>
      %39 = vector.shape_cast %38 : vector<1x1x64x32xbf16> to vector<64x32xbf16>
      %cst_30 = arith.constant dense<0.000000e+00> : vector<64x256xf32>
      %40 = tpu.matmul %39, %34, %cst_30 {dimension_numbers = #tpu.dot_dimension_numbers<[1], [0], [0], [1], [0, 0, 1, 1], [], []>} : vector<64x32xbf16>, vector<32x256xbf16>, vector<64x256xf32> -> vector<64x256xf32>
      %c0_31 = arith.constant 0 : index
      %c2 = arith.constant 2 : index
      %c0_32 = arith.constant 0 : index
      %c0_33 = arith.constant 0 : index
      %41 = vector.load %arg3[%c0_31, %c2, %c0_32, %c0_33] : memref<1x4x64x32xbf16, #tpu.memory_space<vmem>>, vector<1x1x64x32xbf16>
      %42 = vector.shape_cast %41 : vector<1x1x64x32xbf16> to vector<64x32xbf16>
      %cst_34 = arith.constant dense<0.000000e+00> : vector<64x256xf32>
      %43 = tpu.matmul %42, %34, %cst_34 {dimension_numbers = #tpu.dot_dimension_numbers<[1], [0], [0], [1], [0, 0, 1, 1], [], []>} : vector<64x32xbf16>, vector<32x256xbf16>, vector<64x256xf32> -> vector<64x256xf32>
      %c0_35 = arith.constant 0 : index
      %c3 = arith.constant 3 : index
      %c0_36 = arith.constant 0 : index
      %c0_37 = arith.constant 0 : index
      %44 = vector.load %arg3[%c0_35, %c3, %c0_36, %c0_37] : memref<1x4x64x32xbf16, #tpu.memory_space<vmem>>, vector<1x1x64x32xbf16>
      %45 = vector.shape_cast %44 : vector<1x1x64x32xbf16> to vector<64x32xbf16>
      %cst_38 = arith.constant dense<0.000000e+00> : vector<64x256xf32>
      %46 = tpu.matmul %45, %34, %cst_38 {dimension_numbers = #tpu.dot_dimension_numbers<[1], [0], [0], [1], [0, 0, 1, 1], [], []>} : vector<64x32xbf16>, vector<32x256xbf16>, vector<64x256xf32> -> vector<64x256xf32>
      %47 = arith.maximumf %37, %40 : vector<64x256xf32>
      %48 = arith.maximumf %43, %46 : vector<64x256xf32>
      %49 = arith.maximumf %47, %48 : vector<64x256xf32>
      %50 = arith.truncf %49 : vector<64x256xf32> to vector<64x256xbf16>
      %c0_39 = arith.constant 0 : index
      %c0_40 = arith.constant 0 : index
      %51 = vector.load %arg9[%c0_39, %c0_40] : memref<64x256xbf16, #tpu.memory_space<vmem>>, vector<64x256xbf16>
      tpu.vector_store %arg9[%c0_39, %c0_40], %50 {strides = array<i32>} : memref<64x256xbf16, #tpu.memory_space<vmem>>, vector<64x256xbf16>,
    } else {
    }
    %c0 = arith.constant 0 : index
    %c0_1 = arith.constant 0 : index
    %c0_2 = arith.constant 0 : index
    %3 = vector.load %arg2[%c0, %c0_1, %c0_2] : memref<1x128x32xf32, #tpu.memory_space<vmem>>, vector<1x128x32xf32>
    %4 = vector.shape_cast %3 : vector<1x128x32xf32> to vector<128x32xf32>
    %5 = arith.truncf %4 : vector<128x32xf32> to vector<128x32xbf16>
    %c0_3 = arith.constant 0 : index
    %c0_4 = arith.constant 0 : index
    %6 = vector.load %arg4[%c0_3, %c0_4] : memref<32x128xbf16, #tpu.memory_space<vmem>>, vector<32x128xbf16>
    %cst = arith.constant dense<0.000000e+00> : vector<128x128xf32>
    %7 = tpu.matmul %5, %6, %cst {dimension_numbers = #tpu.dot_dimension_numbers<[1], [0], [0], [1], [0, 0, 1, 1], [], []>} : vector<128x32xbf16>, vector<32x128xbf16>, vector<128x128xf32> -> vector<128x128xf32>
    %8 = arith.truncf %7 : vector<128x128xf32> to vector<128x128xbf16>
    %c0_5 = arith.constant 0 : index
    %c0_6 = arith.constant 0 : index
    %9 = vector.load %arg9[%c0_5, %c0_6] : memref<64x256xbf16, #tpu.memory_space<vmem>>, vector<64x128xbf16>
    %cst_7 = arith.constant dense<0.000000e+00> : vector<128x64xf32>
    %10 = tpu.matmul %8, %9, %cst_7 {dimension_numbers = #tpu.dot_dimension_numbers<[1], [1], [0], [0], [0, 0, 1, 0], [], []>} : vector<128x128xbf16>, vector<64x128xbf16>, vector<128x64xf32> -> vector<128x64xf32>
    %cst_8 = arith.constant dense<0xFF800000> : vector<128xf32>
    %11 = vector.multi_reduction <maximumf>, %10, %cst_8 [1] : vector<128x64xf32> to vector<128xf32>
    %12 = vector.shape_cast %11 : vector<128xf32> to vector<128x1xf32>
    %13 = vector.broadcast %12 : vector<128x1xf32> to vector<128x64xf32>
    %14 = arith.subf %10, %13 : vector<128x64xf32>
    %15 = math.exp %14 : vector<128x64xf32>
    %cst_9 = arith.constant dense<0.000000e+00> : vector<128xf32>
    %16 = vector.multi_reduction <add>, %15, %cst_9 [1] : vector<128x64xf32> to vector<128xf32>
    %17 = vector.shape_cast %16 : vector<128xf32> to vector<128x1xf32>
    %18 = arith.truncf %15 : vector<128x64xf32> to vector<128x64xbf16>
    %c0_10 = arith.constant 0 : index
    %c128 = arith.constant 128 : index
    %19 = vector.load %arg9[%c0_10, %c128] : memref<64x256xbf16, #tpu.memory_space<vmem>>, vector<64x128xbf16>
    %cst_11 = arith.constant dense<0.000000e+00> : vector<128x128xf32>
    %20 = tpu.matmul %18, %19, %cst_11 {dimension_numbers = #tpu.dot_dimension_numbers<[1], [0], [0], [1], [0, 0, 1, 1], [], []>} : vector<128x64xbf16>, vector<64x128xbf16>, vector<128x128xf32> -> vector<128x128xf32>
    %21 = tpu.reciprocal %17 {approx = true} : vector<128x1xf32> -> vector<128x1xf32>
    %22 = vector.broadcast %21 : vector<128x1xf32> to vector<128x128xf32>
    %23 = arith.mulf %20, %22 : vector<128x128xf32>
    %24 = arith.truncf %23 : vector<128x128xf32> to vector<128x128xbf16>
    %c0_12 = arith.constant 0 : index
    %c0_13 = arith.constant 0 : index
    %25 = vector.load %arg6[%c0_12, %c0_13] : memref<128x32xbf16, #tpu.memory_space<vmem>>, vector<128x32xbf16>
    %cst_14 = arith.constant dense<0.000000e+00> : vector<128x32xf32>
    %26 = tpu.matmul %24, %25, %cst_14 {dimension_numbers = #tpu.dot_dimension_numbers<[1], [0], [0], [1], [0, 0, 1, 1], [], []>} : vector<128x128xbf16>, vector<128x32xbf16>, vector<128x32xf32> -> vector<128x32xf32>
    %c0_15 = arith.constant 0 : index
    %c0_16 = arith.constant 0 : index
    %27 = memref.load %arg7[%c0_15, %c0_16] : memref<1x1xf32, #tpu.memory_space<smem>>
    %28 = vector.broadcast %27 : f32 to vector<128x32xf32>
    %29 = arith.mulf %28, %26 : vector<128x32xf32>
    %30 = arith.addf %29, %4 : vector<128x32xf32>
    %c0_17 = arith.constant 0 : index
    %c0_18 = arith.constant 0 : index
    %c0_19 = arith.constant 0 : index
    %31 = vector.load %arg8[%c0_17, %c0_18, %c0_19] : memref<1x128x32xf32, #tpu.memory_space<vmem>>, vector<1x128x32xf32>
    %32 = vector.shape_cast %31 : vector<1x128x32xf32> to vector<128x32xf32>
    %33 = vector.shape_cast %30 : vector<128x32xf32> to vector<1x128x32xf32>
    tpu.vector_store %arg8[%c0_17, %c0_18, %c0_19], %33 {strides = array<i32>} : memref<1x128x32xf32, #tpu.memory_space<vmem>>, vector<1x128x32xf32>,
    return
  }
  func.func @transform_0(%arg0: i32, %arg1: i32) -> (i32, i32, i32) {
    %c0_i32 = arith.constant 0 : i32
    %c0_i32_0 = arith.constant 0 : i32
    return %arg0, %arg1, %c0_i32 : i32, i32, i32
  }
  func.func @transform_1(%arg0: i32, %arg1: i32) -> (i32, i32, i32, i32) {
    %c0_i32 = arith.constant 0 : i32
    %c0_i32_0 = arith.constant 0 : i32
    %c0_i32_1 = arith.constant 0 : i32
    %c0_i32_2 = arith.constant 0 : i32
    return %arg0, %c0_i32, %c0_i32_0, %c0_i32_1 : i32, i32, i32, i32
  }
  func.func @transform_2(%arg0: i32, %arg1: i32) -> (i32, i32) {
    %c0_i32 = arith.constant 0 : i32
    %c0_i32_0 = arith.constant 0 : i32
    %c0_i32_1 = arith.constant 0 : i32
    return %c0_i32, %c0_i32_0 : i32, i32
  }
  func.func @transform_3(%arg0: i32, %arg1: i32) -> (i32, i32) {
    %c0_i32 = arith.constant 0 : i32
    %c0_i32_0 = arith.constant 0 : i32
    %c0_i32_1 = arith.constant 0 : i32
    return %c0_i32, %c0_i32_0 : i32, i32
  }
  func.func @transform_4(%arg0: i32, %arg1: i32) -> (i32, i32) {
    %c0_i32 = arith.constant 0 : i32
    %c0_i32_0 = arith.constant 0 : i32
    %c0_i32_1 = arith.constant 0 : i32
    return %c0_i32, %c0_i32_0 : i32, i32
  }
  func.func @transform_5(%arg0: i32, %arg1: i32) -> (i32, i32) {
    %c0_i32 = arith.constant 0 : i32
    %c0_i32_0 = arith.constant 0 : i32
    %c0_i32_1 = arith.constant 0 : i32
    return %c0_i32, %c0_i32_0 : i32, i32
  }
  func.func @transform_6(%arg0: i32, %arg1: i32) -> (i32, i32, i32) {
    %c0_i32 = arith.constant 0 : i32
    %c0_i32_0 = arith.constant 0 : i32
    return %arg0, %arg1, %c0_i32 : i32, i32, i32
  }
}

</mosaic_0001>

<bundles_post_ra>
// kernel: tpu_custom_call.1
= control target key start
LH: loop header
LB: loop body
LE: loop exit
PB: predicated region body
PF: predicated region fallthrough
CT: control target
= control target key end

     0   :  { %s2376_s23 = smov 0   ;;  %s2378_s24 = smov 0   ;;  %s2786_s0 = inlined_call_operand.vmem [shape: f32[2,256,32], index: 0, kind: input, shape index: {}]   ;;  %s2787_s1 = inlined_call_operand.vmem [shape: bf16[2,4,64,32], index: 1, kind: input, shape index: {}]   ;;  %s2788_s2 = inlined_call_operand.vmem [shape: bf16[32,128], index: 2, kind: input, shape index: {}]   ;;  %s2789_s3 = inlined_call_operand.vmem [shape: bf16[32,256], index: 3, kind: input, shape index: {}]   ;;  %s2790_s4 = inlined_call_operand.vmem [shape: bf16[128,32], index: 4, kind: input, shape index: {}]   ;;  %s2791_s5 = inlined_call_operand.<no memory space> [shape: f32[1,1], index: 5, kind: input, shape index: {}]   ;;  %s2792_s6 = inlined_call_operand.vmem [shape: f32[2,256,32], index: 6, kind: output, shape index: {}]  }
   0x1   :  { %11 = sst [smem:[#allocation3]] %s2791_s5  ;;  %s2380_s25 = smov 0  }
   0x2   :  { %s2382_s26 = smov 0   ;;  %s2384_s27 = smov 0  }
   0x3 LB: > { %s26_s5 = sadd.s32 1, %s2327_s25  ;;  %s29_s28 = sadd.s32 1, %s2331_s26  ;;  %s2335_s27 = sphi %s2384_s27, %s17_s27   ;;  %s2331_s26 = sphi %s2382_s26, %s2796_s26   ;;  %s2327_s25 = sphi %s2380_s25, %s2795_s25   ;;  %s2323_s24 = sphi %s2378_s24, %s2794_s24   ;;  %s2319_s23 = sphi %s2376_s23, %s2793_s23  }
   0x4   : > { %p27_p0 = scmp.ge.s32.totalorder %s26_s5, 2  ;;  %p1863_p1 = scmp.ge.s32.totalorder %s2335_s27, 1 }
   0x5   : > { %p244_p2 = scmp.lt.s32.totalorder %s2335_s27, 5 }
   0x6   : > { %s2798_s5 = smov (%p27_p0, %s26_s5), 0  ;;  %s2800_s28 = smov (!%p27_p0, %s29_s28), %s2331_s26 }
   0x7   : > { %p245_p3 = pnand %p1863_p1, %p244_p2  ;;  %p31_p4 = scmp.ge.s32.totalorder %s2800_s28, 2 }
   0x8   : > { %s1864_s29 = sshll.u32 (!%p245_p3), %s2319_s23, 4  ;;  %p288_p5 = scmp.lt.s32.totalorder (!%p245_p3), %s2323_s24, 1 }
   0x9   : > { %s2802_s28 = smov (%p31_p4, %s2800_s28), 0  ;;  %248 = sbr.rel (%p245_p3) target bundleno = 1299 (0x513), region = 44 }
   0xa   : > { %p290_p6 = scmp.lt.s32.totalorder (!%p245_p3), %s1864_s29, 31  ;;  %p1872_p7 = scmp.ne.s32.totalorder (!%p245_p3), %s2319_s23, 0 }
   0xe   : > { %s2804_s24 = smov (!%p288_p5, %s2323_s24), 1  ;;  %s2806_s29 = smov (!%p290_p6, %s1864_s29), 31 }
   0xf   : > { %s1865_s30 = sshll.u32 %s2804_s24, 5  ;;  %s1977_s7 = sshll.u32 %s2804_s24, 7 }
  0x10   : > { %s293_s8 = sadd.s32 %s1865_s30, %s2806_s29  ;;  %s2409_s11 = scalar_lea.vmem %s2787_s1, %s1977_s7 }
  0x11   : > { %s1866_s12 = sshll.u32 %s293_s8, 3  ;;  %316 = sbr.rel (%p1872_p7) target bundleno = 294 (0x126), region = 48 }
  0x12   : > { %s2414_s15 = scalar_lea.vmem %s2786_s0, %s1866_s12  ;;  %s2419_s18 = scalar_lea.vmem %s2792_s6, %s1866_s12 }
  0x16   : > { %v2193_v0 = vld [vmem:[%s2789_s3 + $0x14] ss:$8 sps:$4 sm:$0xff]   ;;  %v2195_v1 = vld [vmem:[%s2789_s3 + $0x10] ss:$8 sps:$4 sm:$0xff]   ;;  %v2337_v2 = vmov 0   ;;  %v2199_v5 = vld [vmem:[%s2409_s11] sm:$0xff]  }
  0x17   : > { %414 = vmatprep.mubr.bf16.mxu0 %v2337_v2  ;;  %528 = vmatprep.mubr.bf16.mxu1 %v2337_v2  ;;  %v2196_v3 = vld [vmem:[%s2789_s3 + $0x4] ss:$8 sps:$4 sm:$0xff]   ;;  %v2198_v4 = vld [vmem:[%s2789_s3] ss:$8 sps:$4 sm:$0xff]   ;;  %vm369_vm0 = vcmask 261120   ;;  %v2203_v9 = vld [vmem:[%s2409_s11 + $0x10] sm:$0xff]  }
  0x18   : > { %394 = vmatprep.subr.bf16.mxu0 %v2193_v0  ;;  %508 = vmatprep.subr.bf16.mxu1 %v2193_v0  ;;  %v2200_v6 = vld [vmem:[%s2409_s11 + $0x20] sm:$0xff]   ;;  %v2201_v7 = vld [vmem:[%s2409_s11 + $0x8] sm:$0xff]   ;;  %v2204_v10 = vld [vmem:[%s2409_s11 + $0x30] sm:$0xff]  }
  0x19   : > { %395 = vmatpush1.bf16.msra.mxu0 %v2195_v1  ;;  %509 = vmatpush1.bf16.msra.mxu1 %v2195_v1  ;;  %v2202_v8 = vld [vmem:[%s2409_s11 + $0x28] sm:$0xff]   ;;  %v2205_v11 = vld [vmem:[%s2409_s11 + $0x18] sm:$0xff]   ;;  %v2207_v13 = vld [vmem:[%s2409_s11 + $0x40] sm:$0xff]  }
  0x1a   : > { %396 = vmatprep.subr.bf16.mxu0 %v2196_v3  ;;  %510 = vmatprep.subr.bf16.mxu1 %v2196_v3  ;;  %v2206_v12 = vld [vmem:[%s2409_s11 + $0x38] sm:$0xff]   ;;  %v2208_v14 = vld [vmem:[%s2409_s11 + $0x60] sm:$0xff]   ;;  %v2209_v15 = vld [vmem:[%s2409_s11 + $0x48] sm:$0xff]  }
  0x1b   : > { %v2210_v16 = vld [vmem:[%s2409_s11 + $0x68] sm:$0xff]   ;;  %v2211_v17 = vld [vmem:[%s2409_s11 + $0x50] sm:$0xff]   ;;  %v2213_v19 = vld [vmem:[%s2409_s11 + $0x58] sm:$0xff]  }
  0x1c   : > { %v2212_v18 = vld [vmem:[%s2409_s11 + $0x70] sm:$0xff]   ;;  %v2214_v20 = vld [vmem:[%s2409_s11 + $0x78] sm:$0xff]  }
  0x1d   : > { %397 = vmatpush1.bf16.msra.mxu0 %v2198_v4  ;;  %511 = vmatpush1.bf16.msra.mxu1 %v2198_v4 }
  0x1e   : > { %622 = vmatprep.subr.bf16.mxu0 %v2193_v0  ;;  %736 = vmatprep.subr.bf16.mxu1 %v2193_v0 }
  0x20   : > { %1881 = vmatmul.mubr.msk.bf16.vlgmr.msra.gmra.mxu0 %vm369_vm0, %v2199_v5  ;;  %1897 = vmatmul.mubr.msk.bf16.vlgmr.msra.gmra.mxu1 %vm369_vm0, %v2200_v6 }
  0x21   : > { %623 = vmatpush1.bf16.msra.mxu0 %v2195_v1  ;;  %737 = vmatpush1.bf16.msra.mxu1 %v2195_v1 }
  0x22   : > { %424 = vmatprep.mubr.bf16.mxu0 %v2337_v2  ;;  %538 = vmatprep.mubr.bf16.mxu1 %v2337_v2 }
  0x23   : > { %624 = vmatprep.subr.bf16.mxu0 %v2196_v3  ;;  %738 = vmatprep.subr.bf16.mxu1 %v2196_v3 }
  0x25   : > { %625 = vmatpush1.bf16.msra.mxu0 %v2198_v4  ;;  %739 = vmatpush1.bf16.msra.mxu1 %v2198_v4 }
  0x28   : > { %1882 = vmatmul.mubr.msk.bf16.gmra.mxu0 %vm369_vm0, %v2201_v7  ;;  %1898 = vmatmul.mubr.msk.bf16.gmra.mxu1 %vm369_vm0, %v2202_v8 }
  0x29   : > { %434 = vmatprep.mubr.bf16.mxu0 %v2337_v2  ;;  %548 = vmatprep.mubr.bf16.mxu1 %v2337_v2 }
  0x30   : > { %1883 = vmatmul.mubr.msk.bf16.gmra.mxu0 %vm369_vm0, %v2203_v9  ;;  %1899 = vmatmul.mubr.msk.bf16.gmra.mxu1 %vm369_vm0, %v2204_v10 }
  0x31   : > { %444 = vmatprep.mubr.bf16.mxu0 %v2337_v2  ;;  %558 = vmatprep.mubr.bf16.mxu1 %v2337_v2 }
  0x38   : > { %1884 = vmatmul.mubr.msk.bf16.gmra.mxu0 %vm369_vm0, %v2205_v11  ;;  %1900 = vmatmul.mubr.msk.bf16.gmra.mxu1 %vm369_vm0, %v2206_v12 }
  0x39   : > { %642 = vmatprep.mubr.bf16.mxu0 %v2337_v2  ;;  %756 = vmatprep.mubr.bf16.mxu1 %v2337_v2 }
  0x40   : > { %1913 = vmatmul.mubr.msk.bf16.vlgmr.msra.gmra.mxu0 %vm369_vm0, %v2207_v13  ;;  %1929 = vmatmul.mubr.msk.bf16.vlgmr.msra.gmra.mxu1 %vm369_vm0, %v2208_v14 }
  0x41   : > { %652 = vmatprep.mubr.bf16.mxu0 %v2337_v2  ;;  %766 = vmatprep.mubr.bf16.mxu1 %v2337_v2 }
  0x48   : > { %1914 = vmatmul.mubr.msk.bf16.gmra.mxu0 %vm369_vm0, %v2209_v15  ;;  %1930 = vmatmul.mubr.msk.bf16.gmra.mxu1 %vm369_vm0, %v2210_v16 }
  0x49   : > { %662 = vmatprep.mubr.bf16.mxu0 %v2337_v2  ;;  %776 = vmatprep.mubr.bf16.mxu1 %v2337_v2 }
  0x50   : > { %1915 = vmatmul.mubr.msk.bf16.gmra.mxu0 %vm369_vm0, %v2211_v17  ;;  %1931 = vmatmul.mubr.msk.bf16.gmra.mxu1 %vm369_vm0, %v2212_v18 }
  0x51   : > { %672 = vmatprep.mubr.bf16.mxu0 %v2337_v2  ;;  %786 = vmatprep.mubr.bf16.mxu1 %v2337_v2 }
  0x58   : > { %1916 = vmatmul.mubr.msk.bf16.gmra.mxu0 %vm369_vm0, %v2213_v19  ;;  %1932 = vmatmul.mubr.msk.bf16.gmra.mxu1 %vm369_vm0, %v2214_v20 }
  0xe0   : > { %v416_v21 = vpop.f32.mrf.mxu0  ;;  %v530_v22 = vpop.f32.mrf.mxu1 }
  0xe1   : > { %v797_v58 = vmax.f32 %v416_v21, %v530_v22 }
  0xe2   : > { %v418_v23 = vpop.f32.mrf.mxu0  ;;  %v532_v24 = vpop.f32.mrf.mxu1 }
  0xe3   : > { %v798_v59 = vmax.f32 %v418_v23, %v532_v24 }
  0xe4   : > { %v420_v25 = vpop.f32.mrf.mxu0  ;;  %v534_v26 = vpop.f32.mrf.mxu1 }
  0xe5   : > { %v799_v4 = vmax.f32 %v420_v25, %v534_v26 }
  0xe6   : > { %v422_v27 = vpop.f32.mrf.mxu0  ;;  %v536_v28 = vpop.f32.mrf.mxu1 }
  0xe7   : > { %v800_v5 = vmax.f32 %v422_v27, %v536_v28 }
  0xe8   : > { %v426_v29 = vpop.f32.mrf.mxu0  ;;  %v540_v30 = vpop.f32.mrf.mxu1 }
  0xe9   : > { %v801_v15 = vmax.f32 %v426_v29, %v540_v30 }
  0xea   : > { %v428_v31 = vpop.f32.mrf.mxu0  ;;  %v542_v32 = vpop.f32.mrf.mxu1 }
  0xeb   : > { %v802_v16 = vmax.f32 %v428_v31, %v542_v32 }
  0xec   : > { %v2465_v33 = vpop.f32.mrf.mxu0  ;;  %v2467_v34 = vpop.f32.mrf.mxu1 }
  0xed   : > { %v803_v26 = vmax.f32 %v2465_v33, %v2467_v34 }
  0xee   : > { %v2469_v35 = vpop.f32.mrf.mxu0  ;;  %v2471_v36 = vpop.f32.mrf.mxu1 }
  0xef   : > { %v804_v27 = vmax.f32 %v2469_v35, %v2471_v36 }
  0xf0   : > { %v2473_v37 = vpop.f32.mrf.mxu0  ;;  %v2475_v38 = vpop.f32.mrf.mxu1 }
  0xf2   : > { %v2477_v39 = vpop.f32.mrf.mxu0  ;;  %v2479_v40 = vpop.f32.mrf.mxu1 }
  0xf4   : > { %v2481_v41 = vpop.f32.mrf.mxu0  ;;  %v2483_v42 = vpop.f32.mrf.mxu1 }
  0xf6   : > { %v2485_v43 = vpop.f32.mrf.mxu0  ;;  %v2487_v44 = vpop.f32.mrf.mxu1 }
  0xf8   : > { %v2489_v45 = vpop.f32.mrf.mxu0  ;;  %v2491_v46 = vpop.f32.mrf.mxu1 }
  0xfa   : > { %v2493_v47 = vpop.f32.mrf.mxu0  ;;  %v2495_v48 = vpop.f32.mrf.mxu1 }
  0xfc   : > { %v2497_v49 = vpop.f32.mrf.mxu0  ;;  %v2499_v50 = vpop.f32.mrf.mxu1 }
  0xfe   : > { %v2501_v51 = vpop.f32.mrf.mxu0  ;;  %v2503_v52 = vpop.f32.mrf.mxu1 }
 0x100   : > { %v644_v53 = vpop.f32.mrf.mxu0  ;;  %v758_v54 = vpop.f32.mrf.mxu1 }
 0x101   : > { %v813_v55 = vmax.f32 %v644_v53, %v758_v54 }
 0x102   : > { %v646_v56 = vpop.f32.mrf.mxu0  ;;  %v760_v57 = vpop.f32.mrf.mxu1 }
 0x103   : > { %v814_v60 = vmax.f32 %v646_v56, %v760_v57  ;;  %v829_v63 = vmax.f32 %v797_v58, %v813_v55  ;;  %v805_v57 = vmax.f32 %v2473_v37, %v2475_v38  ;;  %v806_v58 = vmax.f32 %v2477_v39, %v2479_v40 }
 0x104   : > { %v648_v61 = vpop.f32.mrf.mxu0  ;;  %v762_v62 = vpop.f32.mrf.mxu1 }
 0x105   : > { %v830_v0 = vmax.f32 %v798_v59, %v814_v60  ;;  %v815_v1 = vmax.f32 %v648_v61, %v762_v62 }
 0x106   : > { %v650_v2 = vpop.f32.mrf.mxu0  ;;  %v764_v3 = vpop.f32.mrf.mxu1 }
 0x107   : > { %v1978_v6 = vpack.c.bf16 %v830_v0, %v829_v63  ;;  %v816_v7 = vmax.f32 %v650_v2, %v764_v3  ;;  %v831_v10 = vmax.f32 %v799_v4, %v815_v1  ;;  %v807_v0 = vmax.f32 %v2481_v41, %v2483_v42 }
 0x108   : > { %v654_v8 = vpop.f32.mrf.mxu0  ;;  %v768_v9 = vpop.f32.mrf.mxu1  ;;  %v808_v1 = vmax.f32 %v2485_v43, %v2487_v44 }
 0x109   : > { %893 = vst [vmem:[#allocation2] sm:$0xff] %v1978_v6  ;;  %v832_v11 = vmax.f32 %v800_v5, %v816_v7  ;;  %v817_v12 = vmax.f32 %v654_v8, %v768_v9  ;;  %v809_v7 = vmax.f32 %v2489_v45, %v2491_v46  ;;  %v810_v8 = vmax.f32 %v2493_v47, %v2495_v48 }
 0x10a   : > { %v656_v13 = vpop.f32.mrf.mxu0  ;;  %v770_v14 = vpop.f32.mrf.mxu1 }
 0x10b   : > { %v1979_v17 = vpack.c.bf16 %v832_v11, %v831_v10  ;;  %v818_v18 = vmax.f32 %v656_v13, %v770_v14  ;;  %v833_v21 = vmax.f32 %v801_v15, %v817_v12  ;;  %v811_v14 = vmax.f32 %v2497_v49, %v2499_v50 }
 0x10c   : > { %v658_v19 = vpop.f32.mrf.mxu0  ;;  %v772_v20 = vpop.f32.mrf.mxu1  ;;  %v812_v15 = vmax.f32 %v2501_v51, %v2503_v52 }
 0x10d   : > { %894 = vst [vmem:[#allocation2 + $0x8] sm:$0xff] %v1979_v17  ;;  %v834_v22 = vmax.f32 %v802_v16, %v818_v18  ;;  %v819_v23 = vmax.f32 %v658_v19, %v772_v20 }
 0x10e   : > { %v660_v24 = vpop.f32.mrf.mxu0  ;;  %v774_v25 = vpop.f32.mrf.mxu1 }
 0x10f   : > { %v1980_v28 = vpack.c.bf16 %v834_v22, %v833_v21  ;;  %v820_v53 = vmax.f32 %v660_v24, %v774_v25  ;;  %v835_v31 = vmax.f32 %v803_v26, %v819_v23 }
 0x110   : > { %v664_v29 = vpop.f32.mrf.mxu0  ;;  %v778_v30 = vpop.f32.mrf.mxu1 }
 0x111   : > { %895 = vst [vmem:[#allocation2 + $0x10] sm:$0xff] %v1980_v28  ;;  %v836_v32 = vmax.f32 %v804_v27, %v820_v53  ;;  %v821_v54 = vmax.f32 %v664_v29, %v778_v30 }
 0x112   : > { %v666_v55 = vpop.f32.mrf.mxu0  ;;  %v780_v56 = vpop.f32.mrf.mxu1 }
 0x113   : > { %v1981_v33 = vpack.c.bf16 %v836_v32, %v835_v31  ;;  %v822_v34 = vmax.f32 %v666_v55, %v780_v56  ;;  %v837_v36 = vmax.f32 %v805_v57, %v821_v54 }
 0x114   : > { %v668_v59 = vpop.f32.mrf.mxu0  ;;  %v782_v35 = vpop.f32.mrf.mxu1 }
 0x115   : > { %896 = vst [vmem:[#allocation2 + $0x18] sm:$0xff] %v1981_v33  ;;  %v838_v60 = vmax.f32 %v806_v58, %v822_v34  ;;  %v823_v61 = vmax.f32 %v668_v59, %v782_v35 }
 0x116   : > { %v670_v62 = vpop.f32.mrf.mxu0  ;;  %v784_v63 = vpop.f32.mrf.mxu1 }
 0x117   : > { %v1982_v37 = vpack.c.bf16 %v838_v60, %v837_v36  ;;  %v824_v38 = vmax.f32 %v670_v62, %v784_v63  ;;  %v839_v40 = vmax.f32 %v807_v0, %v823_v61 }
 0x118   : > { %v674_v2 = vpop.f32.mrf.mxu0  ;;  %v788_v39 = vpop.f32.mrf.mxu1 }
 0x119   : > { %897 = vst [vmem:[#allocation2 + $0x20] sm:$0xff] %v1982_v37  ;;  %v840_v3 = vmax.f32 %v808_v1, %v824_v38  ;;  %v825_v4 = vmax.f32 %v674_v2, %v788_v39 }
 0x11a   : > { %v676_v5 = vpop.f32.mrf.mxu0  ;;  %v790_v6 = vpop.f32.mrf.mxu1 }
 0x11b   : > { %v1983_v41 = vpack.c.bf16 %v840_v3, %v839_v40  ;;  %v826_v42 = vmax.f32 %v676_v5, %v790_v6  ;;  %v841_v44 = vmax.f32 %v809_v7, %v825_v4 }
 0x11c   : > { %v678_v9 = vpop.f32.mrf.mxu0  ;;  %v792_v43 = vpop.f32.mrf.mxu1 }
 0x11d   : > { %898 = vst [vmem:[#allocation2 + $0x28] sm:$0xff] %v1983_v41  ;;  %v842_v10 = vmax.f32 %v810_v8, %v826_v42  ;;  %v827_v11 = vmax.f32 %v678_v9, %v792_v43 }
 0x11e   : > { %v680_v12 = vpop.f32.mrf.mxu0  ;;  %v794_v13 = vpop.f32.mrf.mxu1 }
 0x11f   : > { %v1984_v45 = vpack.c.bf16 %v842_v10, %v841_v44  ;;  %v828_v46 = vmax.f32 %v680_v12, %v794_v13  ;;  %v843_v47 = vmax.f32 %v811_v14, %v827_v11 }
 0x121   : > { %899 = vst [vmem:[#allocation2 + $0x30] sm:$0xff] %v1984_v45  ;;  %v844_v48 = vmax.f32 %v812_v15, %v828_v46 }
 0x123   : > { %v1985_v16 = vpack.c.bf16 %v844_v48, %v843_v47 }
 0x125   : > { %900 = vst [vmem:[#allocation2 + $0x38] sm:$0xff] %v1985_v16 }
 0x126 PF: > { %v2215_v49 = vld [vmem:[%s2788_s2 + $0x8] sm:$0xff]   ;;  %v2216_v50 = vld [vmem:[%s2788_s2] sm:$0xff]   ;;  %vm941_vm1 = vcmask 261120   ;;  %v2540_v18 = vld [vmem:[%s2414_s15 + $0x10] sm:$0xff]  ;;  %vm1200_vm2 = vcmask 523264   ;;  %s1707_s8 = sld [smem:[#allocation3]] }
 0x127   : > { %2036 = vmatprep.subr.bf16.mxu0 %v2215_v49  ;;  %v2532_v51 = vld [vmem:[%s2414_s15] sm:$0xff]  ;;  %v2535_v52 = vld [vmem:[%s2414_s15 + $0x8] sm:$0xff]  ;;  %v2543_v19 = vld [vmem:[%s2414_s15 + $0x18] sm:$0xff] }
 0x128   : > { %2037 = vmatpush3.bf16.msra.mxu0 %v2215_v49  ;;  %v917_v17 = vpack.c.bf16 %v2535_v52, %v2532_v51  ;;  %v2546_v20 = vld [vmem:[%s2414_s15 + $0x20] sm:$0xff]  ;;  %v2549_v21 = vld [vmem:[%s2414_s15 + $0x28] sm:$0xff]  ;;  %v918_v22 = vpack.c.bf16 %v2543_v19, %v2540_v18  ;;  %v2557_v25 = vld [vmem:[%s2414_s15 + $0x30] sm:$0xff] }
 0x129   : > { %2038 = vmatprep.subr.bf16.mxu0 %v2216_v50  ;;  %v919_v23 = vpack.c.bf16 %v2549_v21, %v2546_v20  ;;  %v2560_v26 = vld [vmem:[%s2414_s15 + $0x38] sm:$0xff]  ;;  %v2218_v27 = vld [vmem:[#allocation2 + $0x20] ss:$8 sps:$4 sm:$0xff]   ;;  %v2577_v32 = vld [vmem:[%s2414_s15 + $0x50] sm:$0xff] }
 0x12a   : > { %2040 = vmatprep.mubr.msk.bf16.mxu0 %vm941_vm1, %v917_v17  ;;  %v2564_v28 = vld [vmem:[%s2414_s15 + $0x40] sm:$0xff]  ;;  %v2567_v53 = vld [vmem:[%s2414_s15 + $0x48] sm:$0xff]  ;;  %v920_v29 = vpack.c.bf16 %v2560_v26, %v2557_v25  ;;  %v2219_v30 = vld [vmem:[#allocation2 + $0x10] ss:$8 sps:$4 sm:$0xff]  }
 0x12b   : > { %v921_v31 = vpack.c.bf16 %v2567_v53, %v2564_v28  ;;  %v2580_v54 = vld [vmem:[%s2414_s15 + $0x58] sm:$0xff]  ;;  %v2583_v55 = vld [vmem:[%s2414_s15 + $0x60] sm:$0xff]  ;;  %v2586_v56 = vld [vmem:[%s2414_s15 + $0x68] sm:$0xff] }
 0x12c   : > { %2039 = vmatpush3.bf16.msra.mxu0 %v2216_v50  ;;  %v2217_v24 = vld [vmem:[#allocation2 + $0x30] ss:$8 sps:$4 sm:$0xff]   ;;  %v922_v57 = vpack.c.bf16 %v2580_v54, %v2577_v32  ;;  %v923_v58 = vpack.c.bf16 %v2586_v56, %v2583_v55  ;;  %v2220_v35 = vld [vmem:[#allocation2] ss:$8 sps:$4 sm:$0xff]   ;;  %v2221_v11 = vld [vmem:[#allocation2 + $0x34] ss:$8 sps:$4 sm:$0xff]  }
 0x12d   : > { %2056 = vmatprep.subr.bf16.mxu1 %v2217_v24  ;;  %v2595_v33 = vld [vmem:[%s2414_s15 + $0x70] sm:$0xff]  ;;  %v2598_v34 = vld [vmem:[%s2414_s15 + $0x78] sm:$0xff]  ;;  %2080 = vmatprep.subr.bf16.mxu0 %v2221_v11 }
 0x12e   : > { %2057 = vmatpush3.bf16.xpose.msra.mxu1 %v2217_v24  ;;  %v924_v59 = vpack.c.bf16 %v2598_v34, %v2595_v33 }
 0x12f   : > { %2041 = vmatmul.mubr.msk.bf16.vlgmr.msra.gmra.mxu0 %vm941_vm1, %v918_v22  ;;  %2058 = vmatprep.subr.bf16.mxu1 %v2218_v27 }
 0x130   : > { %2044 = vmatprep.mubr.msk.bf16.mxu0 %vm941_vm1, %v919_v23  ;;  %2081 = vmatpush3.bf16.msra.mxu0 %v2221_v11 }
 0x136   : > { %2059 = vmatpush3.bf16.xpose.msra.mxu1 %v2218_v27 }
 0x137   : > { %2045 = vmatmul.mubr.msk.bf16.gmra.mxu0 %vm941_vm1, %v920_v29  ;;  %2060 = vmatprep.subr.bf16.mxu1 %v2219_v30 }
 0x138   : > { %2048 = vmatprep.mubr.msk.bf16.mxu0 %vm941_vm1, %v921_v31 }
 0x13e   : > { %2061 = vmatpush3.bf16.xpose.msra.mxu1 %v2219_v30 }
 0x13f   : > { %2049 = vmatmul.mubr.msk.bf16.gmra.mxu0 %vm941_vm1, %v922_v57  ;;  %2062 = vmatprep.subr.bf16.mxu1 %v2220_v35 }
 0x140   : > { %2052 = vmatprep.mubr.msk.bf16.mxu0 %vm941_vm1, %v923_v58 }
 0x146   : > { %2063 = vmatpush3.bf16.xpose.msra.mxu1 %v2220_v35 }
 0x147   : > { %2053 = vmatmul.mubr.msk.bf16.gmra.mxu0 %vm941_vm1, %v924_v59 }
 0x1ef   : > { %v2042_v36 = vpop.f32.mrf.mxu0 }
 0x1f1   : > { %v1000_v60 = vpop.f32.mrf.mxu0 }
 0x1f3   : > { %v2043_v61 = vpop.f32.mrf.mxu0 }
 0x1f4   : > { %v1064_v0 = vpack.c.bf16 %v2043_v61, %v2042_v36 }
 0x1f5   : > { %v1003_v62 = vpop.f32.mrf.mxu0 }
 0x1f6   : > { %v1063_v63 = vpack.c.bf16 %v1003_v62, %v1000_v60  ;;  %v2222_v60 = vld [vmem:[#allocation2 + $0x24] ss:$8 sps:$4 sm:$0xff]  }
 0x1f7   : > { %v2046_v1 = vpop.f32.mrf.mxu0  ;;  %2082 = vmatprep.subr.bf16.mxu0 %v2222_v60 }
 0x1f8   : > { %2064 = vmatprep.mubr.bf16.mxu1 %v1063_v63  ;;  %2083 = vmatpush3.bf16.msra.mxu0 %v2222_v60 }
 0x1f9   : > { %v1016_v37 = vpop.f32.mrf.mxu0  ;;  %2065 = vmatmul.mubr.bf16.vlgmr.msra.gmra.mxu1 %v1064_v0 }
 0x1fb   : > { %v2047_v38 = vpop.f32.mrf.mxu0 }
 0x1fc   : > { %v1066_v40 = vpack.c.bf16 %v2047_v38, %v2046_v1  ;;  %v2223_v1 = vld [vmem:[#allocation2 + $0x14] ss:$8 sps:$4 sm:$0xff]  }
 0x1fd   : > { %v1019_v2 = vpop.f32.mrf.mxu0  ;;  %2084 = vmatprep.subr.bf16.mxu0 %v2223_v1 }
 0x1fe   : > { %v1065_v39 = vpack.c.bf16 %v1019_v2, %v1016_v37  ;;  %2085 = vmatpush3.bf16.msra.mxu0 %v2223_v1 }
 0x1ff   : > { %v2050_v3 = vpop.f32.mrf.mxu0 }
 0x200   : > { %2068 = vmatprep.mubr.bf16.mxu1 %v1065_v39  ;;  %v2224_v39 = vld [vmem:[#allocation2 + $0x4] ss:$8 sps:$4 sm:$0xff]  }
 0x201   : > { %v1032_v4 = vpop.f32.mrf.mxu0  ;;  %2069 = vmatmul.mubr.bf16.gmra.mxu1 %v1066_v40  ;;  %2086 = vmatprep.subr.bf16.mxu0 %v2224_v39 }
 0x202   : > { %2087 = vmatpush3.bf16.msra.mxu0 %v2224_v39 }
 0x203   : > { %v2051_v5 = vpop.f32.mrf.mxu0 }
 0x204   : > { %v1068_v8 = vpack.c.bf16 %v2051_v5, %v2050_v3 }
 0x205   : > { %v1035_v6 = vpop.f32.mrf.mxu0 }
 0x206   : > { %v1067_v7 = vpack.c.bf16 %v1035_v6, %v1032_v4 }
 0x207   : > { %v2054_v41 = vpop.f32.mrf.mxu0 }
 0x208   : > { %2072 = vmatprep.mubr.bf16.mxu1 %v1067_v7 }
 0x209   : > { %v1048_v42 = vpop.f32.mrf.mxu0  ;;  %2073 = vmatmul.mubr.bf16.gmra.mxu1 %v1068_v8 }
 0x20b   : > { %v2055_v9 = vpop.f32.mrf.mxu0 }
 0x20c   : > { %v1070_v10 = vpack.c.bf16 %v2055_v9, %v2054_v41 }
 0x20d   : > { %v1051_v43 = vpop.f32.mrf.mxu0 }
 0x20e   : > { %v1069_v44 = vpack.c.bf16 %v1051_v43, %v1048_v42 }
 0x210   : > { %2076 = vmatprep.mubr.bf16.mxu1 %v1069_v44 }
 0x211   : > { %2077 = vmatmul.mubr.bf16.gmra.mxu1 %v1070_v10 }
 0x2b9   : > { %v2603_v12 = vpop.f32.mrf.mxu1 }
 0x2ba   : > { %v1207_v13 = vsel %vm1200_vm2, %v2603_v12, -inf }
 0x2bb   : > { %1208 = vmax.xlane.f32.xlu1 %v1207_v13  ;;  %v1137_v14 = vpop.f32.mrf.mxu1 }
 0x2bc   : > { %v1201_v15 = vsel %vm1200_vm2, %v1137_v14, -inf }
 0x2bd   : > { %1202 = vmax.xlane.f32.xlu0 %v1201_v15  ;;  %v2067_v45 = vpop.f32.mrf.mxu1 }
 0x2be   : > { %v1210_v46 = vsel %vm1200_vm2, %v2067_v45, -inf }
 0x2bf   : > { %1211 = vmax.xlane.f32.xlu1 %v1210_v46  ;;  %v1140_v47 = vpop.f32.mrf.mxu1 }
 0x2c0   : > { %v1204_v48 = vsel %vm1200_vm2, %v1140_v47, -inf }
 0x2c1   : > { %1205 = vmax.xlane.f32.xlu0 %v1204_v48  ;;  %v2610_v16 = vpop.f32.mrf.mxu1 }
 0x2c2   : > { %v1219_v23 = vsel %vm1200_vm2, %v2610_v16, -inf }
 0x2c3   : > { %v1153_v49 = vpop.f32.mrf.mxu1 }
 0x2c4   : > { %v1213_v50 = vsel %vm1200_vm2, %v1153_v49, -inf }
 0x2c5   : > { %1214 = vmax.xlane.f32.xlu0 %v1213_v50  ;;  %v2613_v17 = vpop.f32.mrf.mxu1 }
 0x2c6   : > { %v1222_v30 = vsel %vm1200_vm2, %v2613_v17, -inf }
 0x2c7   : > { %v2615_v22 = vpop.f32.mrf.mxu1 }
 0x2c8   : > { %v1216_v24 = vsel %vm1200_vm2, %v2615_v22, -inf }
 0x2c9   : > { %1220 = vmax.xlane.f32.xlu0 %v1219_v23  ;;  %1217 = vmax.xlane.f32.xlu1 %v1216_v24  ;;  %v2621_v27 = vpop.f32.mrf.mxu1 }
 0x2ca   : > { %v1231_v59 = vsel %vm1200_vm2, %v2621_v27, -inf }
 0x2cb   : > { %v2623_v29 = vpop.f32.mrf.mxu1 }
 0x2cc   : > { %v1225_v31 = vsel %vm1200_vm2, %v2623_v29, -inf }
 0x2cd   : > { %1223 = vmax.xlane.f32.xlu1 %v1222_v30  ;;  %1226 = vmax.xlane.f32.xlu0 %v1225_v31  ;;  %v2629_v57 = vpop.f32.mrf.mxu1 }
 0x2ce   : > { %v1234_v62 = vsel %vm1200_vm2, %v2629_v57, -inf }
 0x2cf   : > { %v2631_v58 = vpop.f32.mrf.mxu1 }
 0x2d0   : > { %v1228_v35 = vsel %vm1200_vm2, %v2631_v58, -inf }
 0x2d1   : > { %1232 = vmax.xlane.f32.xlu0 %v1231_v59  ;;  %1229 = vmax.xlane.f32.xlu1 %v1228_v35  ;;  %v2637_v36 = vpop.f32.mrf.mxu1 }
 0x2d2   : > { %v1243_v38 = vsel %vm1200_vm2, %v2637_v36, -inf }
 0x2d3   : > { %v2639_v61 = vpop.f32.mrf.mxu1 }
 0x2d4   : > { %v1237_v63 = vsel %vm1200_vm2, %v2639_v61, -inf }
 0x2d5   : > { %1235 = vmax.xlane.f32.xlu1 %v1234_v62  ;;  %1238 = vmax.xlane.f32.xlu0 %v1237_v63  ;;  %v2645_v0 = vpop.f32.mrf.mxu1 }
 0x2d6   : > { %v1246_v40 = vsel %vm1200_vm2, %v2645_v0, -inf }
 0x2d7   : > { %v2647_v37 = vpop.f32.mrf.mxu1 }
 0x2d8   : > { %v1240_v2 = vsel %vm1200_vm2, %v2647_v37, -inf }
 0x2d9   : > { %1244 = vmax.xlane.f32.xlu0 %v1243_v38  ;;  %1241 = vmax.xlane.f32.xlu1 %v1240_v2 }
 0x2dd   : > { %1247 = vmax.xlane.f32.xlu1 %v1246_v40 }
 0x344   : > { %v1209_v3 = vpop.xlane.xlu1 %1208 }
 0x345   : > { %v1251_v6 = vsub.f32 %v2603_v12, %v1209_v3 }
 0x346   : > { %v1203_v4 = vpop.xlane.xlu0 %1202 }
 0x347   : > { %v1249_v5 = vsub.f32 %v1137_v14, %v1203_v4  ;;  %v1269_v44 = vmul.f32 1.442695, %v1251_v6 }
 0x348   : > { %v1212_v7 = vpop.xlane.xlu1 %1211 }
 0x349   : > { %v1265_v8 = vmul.f32 1.442695, %v1249_v5  ;;  %v1252_v41 = vsub.f32 %v2067_v45, %v1212_v7 }
 0x34a   : > { %v1206_v42 = vpop.xlane.xlu0 %1205 }
 0x34b   : > { %2233 = vpow2.f32 %v1265_v8  ;;  %v1271_v9 = vmul.f32 1.442695, %v1252_v41  ;;  %v1250_v43 = vsub.f32 %v1140_v47, %v1206_v42 }
 0x34d   : > { %v1267_v10 = vmul.f32 1.442695, %v1250_v43  ;;  %2235 = vpow2.f32 %v1271_v9 }
 0x34e   : > { %v1215_v11 = vpop.xlane.xlu0 %1214 }
 0x34f   : > { %2237 = vpow2.f32 %v1267_v10  ;;  %v1253_v13 = vsub.f32 %v1153_v49, %v1215_v11 }
 0x350   : > { %2239 = vpow2.f32 %v1269_v44 }
 0x351   : > { %v1273_v15 = vmul.f32 1.442695, %v1253_v13 }
 0x352   : > { %v1221_v46 = vpop.xlane.xlu0 %1220  ;;  %v1218_v48 = vpop.xlane.xlu1 %1217 }
 0x353   : > { %v1255_v14 = vsub.f32 %v2610_v16, %v1221_v46  ;;  %v1254_v12 = vsub.f32 %v2615_v22, %v1218_v48  ;;  %2241 = vpow2.f32 %v1273_v15 }
 0x355   : > { %v1277_v50 = vmul.f32 1.442695, %v1255_v14  ;;  %v1275_v45 = vmul.f32 1.442695, %v1254_v12 }
 0x356   : > { %v1224_v23 = vpop.xlane.xlu1 %1223  ;;  %v1227_v24 = vpop.xlane.xlu0 %1226 }
 0x357   : > { %2243 = vpow2.f32 %v1277_v50  ;;  %v1256_v47 = vsub.f32 %v2613_v17, %v1224_v23  ;;  %v1257_v30 = vsub.f32 %v2623_v29, %v1227_v24 }
 0x358   : > { %v2234_v31 = vpop.eup %2233  ;;  %2245 = vpow2.f32 %v1275_v45 }
 0x359   : > { %v1279_v49 = vmul.f32 1.442695, %v1256_v47  ;;  %v1297_v59 = vsel %vm1200_vm2, %v2234_v31, 0.0  ;;  %v1281_v35 = vmul.f32 1.442695, %v1257_v30 }
 0x35a   : > { %v1233_v60 = vpop.xlane.xlu0 %1232  ;;  %v1230_v16 = vpop.xlane.xlu1 %1229  ;;  %1298 = vadd.xlane.f32.xlu0 %v1297_v59 }
 0x35b   : > { %v2661_v22 = vpop.eup %2235  ;;  %2247 = vpow2.f32 %v1279_v49  ;;  %v1259_v62 = vsub.f32 %v2621_v27, %v1233_v60  ;;  %v1258_v63 = vsub.f32 %v2631_v58, %v1230_v16 }
 0x35c   : > { %v2238_v1 = vpop.eup %2237  ;;  %2249 = vpow2.f32 %v1281_v35 }
 0x35d   : > { %v2665_v17 = vpop.eup %2239  ;;  %v1285_v29 = vmul.f32 1.442695, %v1259_v62  ;;  %v1283_v38 = vmul.f32 1.442695, %v1258_v63  ;;  %v1300_v2 = vsel %vm1200_vm2, %v2238_v1, 0.0  ;;  %v1345_v39 = vpack.c.bf16 %v2238_v1, %v2234_v31 }
 0x35e   : > { %v1346_v40 = vpack.c.bf16 %v2661_v22, %v2665_v17  ;;  %v1236_v3 = vpop.xlane.xlu1 %1235  ;;  %v1239_v4 = vpop.xlane.xlu0 %1238  ;;  %1301 = vadd.xlane.f32.xlu1 %v1300_v2  ;;  %v1303_v60 = vsel %vm1200_vm2, %v2665_v17, 0.0 }
 0x35f   : > { %2251 = vpow2.f32 %v1285_v29  ;;  %v1260_v27 = vsub.f32 %v2629_v57, %v1236_v3  ;;  %v1261_v58 = vsub.f32 %v2639_v61, %v1239_v4  ;;  %2088 = vmatprep.mubr.msk.bf16.mxu0 %vm1200_vm2, %v1345_v39  ;;  %v2225_v3 = vld [vmem:[%s2790_s4 + $0x38] sm:$0xff]   ;;  %v2227_v4 = vld [vmem:[%s2790_s4 + $0x28] sm:$0xff]  }
 0x360   : > { %2253 = vpow2.f32 %v1283_v38  ;;  %2089 = vmatmul.mubr.msk.bf16.vlgmr.msra.gmra.mxu0 %vm1200_vm2, %v1346_v40  ;;  %v2242_v8 = vpop.eup %2241  ;;  %v1306_v38 = vsel %vm1200_vm2, %v2661_v22, 0.0  ;;  %v2226_v22 = vld [vmem:[%s2790_s4 + $0x30] sm:$0xff]   ;;  %2104 = vmatprep.subr.bf16.mxu0 %v2225_v3 }
 0x361   : > { %v1287_v5 = vmul.f32 1.442695, %v1260_v27  ;;  %v1289_v41 = vmul.f32 1.442695, %v1261_v58  ;;  %2136 = vmatprep.subr.bf16.mxu1 %v2225_v3  ;;  %2105 = vmatpush3.bf16.msra.mxu0 %v2225_v3  ;;  %v2228_v27 = vld [vmem:[%s2790_s4 + $0x20] sm:$0xff]   ;;  %v2229_v58 = vld [vmem:[%s2790_s4 + $0x18] sm:$0xff]  }
 0x362   : > { %v1245_v6 = vpop.xlane.xlu0 %1244  ;;  %v1242_v7 = vpop.xlane.xlu1 %1241  ;;  %2144 = vmatpush3.bf16.msra.mxu1 %v2225_v3  ;;  %2106 = vmatprep.subr.bf16.mxu0 %v2226_v22 }
 0x363   : > { %2255 = vpow2.f32 %v1287_v5  ;;  %v1263_v42 = vsub.f32 %v2637_v36, %v1245_v6  ;;  %v1262_v9 = vsub.f32 %v2647_v37, %v1242_v7  ;;  %v1309_v36 = vsel %vm1200_vm2, %v2242_v8, 0.0  ;;  %2137 = vmatprep.subr.bf16.mxu1 %v2226_v22  ;;  %v2230_v5 = vld [vmem:[%s2790_s4 + $0x10] sm:$0xff]   ;;  %v2231_v6 = vld [vmem:[%s2790_s4 + $0x8] sm:$0xff]   ;;  %v2232_v7 = vld [vmem:[%s2790_s4] sm:$0xff]  }
 0x364   : > { %v2244_v43 = vpop.eup %2243  ;;  %2257 = vpow2.f32 %v1289_v41 }
 0x365   : > { %v2246_v44 = vpop.eup %2245  ;;  %v1291_v57 = vmul.f32 1.442695, %v1262_v9  ;;  %v1315_v61 = vsel %vm1200_vm2, %v2244_v43, 0.0  ;;  %v1293_v10 = vmul.f32 1.442695, %v1263_v42  ;;  %2107 = vmatpush3.bf16.msra.mxu0 %v2226_v22 }
 0x366   : > { %1316 = vadd.xlane.f32.xlu0 %v1315_v61  ;;  %v1248_v11 = vpop.xlane.xlu1 %1247  ;;  %v1347_v13 = vpack.c.bf16 %v2246_v44, %v2242_v8  ;;  %v1312_v23 = vsel %vm1200_vm2, %v2246_v44, 0.0  ;;  %2145 = vmatpush3.bf16.msra.mxu1 %v2226_v22 }
 0x367   : > { %v1264_v15 = vsub.f32 %v2645_v0, %v1248_v11  ;;  %2259 = vpow2.f32 %v1291_v57  ;;  %2108 = vmatprep.subr.bf16.mxu0 %v2227_v4  ;;  %2138 = vmatprep.subr.bf16.mxu1 %v2227_v4 }
 0x368   : > { %v2248_v46 = vpop.eup %2247  ;;  %2092 = vmatprep.mubr.msk.bf16.mxu0 %vm1200_vm2, %v1347_v13  ;;  %2261 = vpow2.f32 %v1293_v10 }
 0x369   : > { %v1295_v48 = vmul.f32 1.442695, %v1264_v15  ;;  %v1318_v37 = vsel %vm1200_vm2, %v2248_v46, 0.0  ;;  %v1348_v14 = vpack.c.bf16 %v2248_v46, %v2244_v43  ;;  %v2250_v12 = vpop.eup %2249  ;;  %2109 = vmatpush3.bf16.msra.mxu0 %v2227_v4 }
 0x36a   : > { %1310 = vadd.xlane.f32.xlu0 %v1309_v36  ;;  %1319 = vadd.xlane.f32.xlu1 %v1318_v37  ;;  %v1321_v30 = vsel %vm1200_vm2, %v2250_v12, 0.0 }
 0x36b   : > { %2263 = vpow2.f32 %v1295_v48  ;;  %2093 = vmatmul.mubr.msk.bf16.gmra.mxu0 %vm1200_vm2, %v1348_v14  ;;  %2146 = vmatpush3.bf16.msra.mxu1 %v2227_v4 }
 0x36c   : > { %v2252_v50 = vpop.eup %2251  ;;  %2110 = vmatprep.subr.bf16.mxu0 %v2228_v27  ;;  %2139 = vmatprep.subr.bf16.mxu1 %v2228_v27 }
 0x36d   : > { %v2254_v45 = vpop.eup %2253  ;;  %v1327_v0 = vsel %vm1200_vm2, %v2252_v50, 0.0  ;;  %2111 = vmatpush3.bf16.msra.mxu0 %v2228_v27 }
 0x36e   : > { %1328 = vadd.xlane.f32.xlu0 %v1327_v0  ;;  %1313 = vadd.xlane.f32.xlu1 %v1312_v23  ;;  %v1349_v24 = vpack.c.bf16 %v2254_v45, %v2250_v12  ;;  %v1324_v16 = vsel %vm1200_vm2, %v2254_v45, 0.0 }
 0x36f   : > { %2147 = vmatpush3.bf16.msra.mxu1 %v2228_v27  ;;  %2112 = vmatprep.subr.bf16.mxu0 %v2229_v58 }
 0x370   : > { %v2256_v47 = vpop.eup %2255  ;;  %2096 = vmatprep.mubr.msk.bf16.mxu0 %vm1200_vm2, %v1349_v24  ;;  %2140 = vmatprep.subr.bf16.mxu1 %v2229_v58 }
 0x371   : > { %v1330_v31 = vsel %vm1200_vm2, %v2256_v47, 0.0  ;;  %v1350_v49 = vpack.c.bf16 %v2256_v47, %v2252_v50  ;;  %v2258_v59 = vpop.eup %2257  ;;  %2113 = vmatpush3.bf16.msra.mxu0 %v2229_v58 }
 0x372   : > { %1322 = vadd.xlane.f32.xlu0 %v1321_v30  ;;  %1331 = vadd.xlane.f32.xlu1 %v1330_v31  ;;  %v1333_v29 = vsel %vm1200_vm2, %v2258_v59, 0.0 }
 0x373   : > { %2097 = vmatmul.mubr.msk.bf16.gmra.mxu0 %vm1200_vm2, %v1350_v49  ;;  %2148 = vmatpush3.bf16.msra.mxu1 %v2229_v58 }
 0x374   : > { %v2260_v35 = vpop.eup %2259  ;;  %2114 = vmatprep.subr.bf16.mxu0 %v2230_v5  ;;  %2141 = vmatprep.subr.bf16.mxu1 %v2230_v5 }
 0x375   : > { %v1351_v62 = vpack.c.bf16 %v2260_v35, %v2258_v59  ;;  %v2262_v63 = vpop.eup %2261  ;;  %v1336_v39 = vsel %vm1200_vm2, %v2260_v35, 0.0  ;;  %2115 = vmatpush3.bf16.msra.mxu0 %v2230_v5 }
 0x376   : > { %1304 = vadd.xlane.f32.xlu0 %v1303_v60  ;;  %1325 = vadd.xlane.f32.xlu1 %v1324_v16  ;;  %v1339_v17 = vsel %vm1200_vm2, %v2262_v63, 0.0 }
 0x377   : > { %2100 = vmatprep.mubr.msk.bf16.mxu0 %vm1200_vm2, %v1351_v62  ;;  %2149 = vmatpush3.bf16.msra.mxu1 %v2230_v5 }
 0x378   : > { %v2264_v1 = vpop.eup %2263  ;;  %2116 = vmatprep.subr.bf16.mxu0 %v2231_v6  ;;  %2142 = vmatprep.subr.bf16.mxu1 %v2231_v6 }
 0x379   : > { %v1352_v2 = vpack.c.bf16 %v2264_v1, %v2262_v63  ;;  %v1342_v40 = vsel %vm1200_vm2, %v2264_v1, 0.0  ;;  %2117 = vmatpush3.bf16.msra.mxu0 %v2231_v6 }
 0x37a   : > { %1334 = vadd.xlane.f32.xlu0 %v1333_v29  ;;  %1307 = vadd.xlane.f32.xlu1 %v1306_v38 }
 0x37b   : > { %2101 = vmatmul.mubr.msk.bf16.gmra.mxu0 %vm1200_vm2, %v1352_v2  ;;  %2150 = vmatpush3.bf16.msra.mxu1 %v2231_v6 }
 0x37c   : > { %2118 = vmatprep.subr.bf16.mxu0 %v2232_v7  ;;  %2143 = vmatprep.subr.bf16.mxu1 %v2232_v7 }
 0x37d   : > { %2119 = vmatpush3.bf16.msra.mxu0 %v2232_v7 }
 0x37e   : > { %1340 = vadd.xlane.f32.xlu0 %v1339_v17  ;;  %1337 = vadd.xlane.f32.xlu1 %v1336_v39 }
 0x37f   : > { %2151 = vmatpush3.bf16.msra.mxu1 %v2232_v7 }
 0x382   : > { %1343 = vadd.xlane.f32.xlu1 %v1342_v40 }
 0x3e3   : > { %v1299_v41 = vpop.xlane.xlu0 %1298 }
 0x3e4   : > { %2265 = vrcp.f32 %v1299_v41 }
 0x3e7   : > { %v1302_v8 = vpop.xlane.xlu1 %1301 }
 0x3ef   : > { %v1317_v9 = vpop.xlane.xlu0 %1316 }
 0x3f1   : > { %v2266_v36 = vpop.eup %2265 }
 0x3f3   : > { %v1320_v42 = vpop.xlane.xlu1 %1319  ;;  %v1311_v44 = vpop.xlane.xlu0 %1310 }
 0x3f7   : > { %v1314_v43 = vpop.xlane.xlu1 %1313  ;;  %v1329_v61 = vpop.xlane.xlu0 %1328 }
 0x3fb   : > { %v1332_v57 = vpop.xlane.xlu1 %1331  ;;  %v1323_v11 = vpop.xlane.xlu0 %1322 }
 0x3ff   : > { %v1326_v10 = vpop.xlane.xlu1 %1325  ;;  %v1305_v15 = vpop.xlane.xlu0 %1304 }
 0x403   : > { %v1308_v13 = vpop.xlane.xlu1 %1307  ;;  %v1335_v35 = vpop.xlane.xlu0 %1334 }
 0x404   : > { %2267 = vrcp.f32 %v1308_v13 }
 0x405   : > { %2269 = vrcp.f32 %v1302_v8 }
 0x406   : > { %2271 = vrcp.f32 %v1305_v15 }
 0x407   : > { %2273 = vrcp.f32 %v1311_v44  ;;  %v1338_v31 = vpop.xlane.xlu1 %1337  ;;  %v1341_v39 = vpop.xlane.xlu0 %1340 }
 0x408   : > { %2275 = vrcp.f32 %v1320_v42 }
 0x409   : > { %2277 = vrcp.f32 %v1314_v43 }
 0x40a   : > { %2279 = vrcp.f32 %v1317_v9 }
 0x40b   : > { %2281 = vrcp.f32 %v1323_v11  ;;  %v1344_v1 = vpop.xlane.xlu1 %1343 }
 0x40c   : > { %2283 = vrcp.f32 %v1332_v57 }
 0x40d   : > { %2285 = vrcp.f32 %v1326_v10 }
 0x40e   : > { %2287 = vrcp.f32 %v1329_v61 }
 0x40f   : > { %2289 = vrcp.f32 %v1335_v35 }
 0x410   : > { %2291 = vrcp.f32 %v1344_v1 }
 0x411   : > { %v2268_v14 = vpop.eup %2267  ;;  %2293 = vrcp.f32 %v1338_v31 }
 0x412   : > { %v2270_v12 = vpop.eup %2269  ;;  %2295 = vrcp.f32 %v1341_v39 }
 0x413   : > { %v2272_v0 = vpop.eup %2271 }
 0x414   : > { %v2274_v16 = vpop.eup %2273 }
 0x415   : > { %v2276_v63 = vpop.eup %2275 }
 0x416   : > { %v2278_v29 = vpop.eup %2277 }
 0x417   : > { %v2280_v17 = vpop.eup %2279 }
 0x418   : > { %v2282_v6 = vpop.eup %2281 }
 0x419   : > { %v2284_v8 = vpop.eup %2283 }
 0x41a   : > { %v2286_v41 = vpop.eup %2285 }
 0x41b   : > { %v2288_v43 = vpop.eup %2287 }
 0x420   : > { %v2090_v46 = vpop.f32.mrf.mxu0 }
 0x421   : > { %v1524_v47 = vmul.f32 %v2272_v0, %v2090_v46  ;;  %v2290_v46 = vpop.eup %2289 }
 0x422   : > { %v1443_v48 = vpop.f32.mrf.mxu0 }
 0x423   : > { %v1522_v23 = vmul.f32 %v2266_v36, %v1443_v48  ;;  %v2292_v36 = vpop.eup %2291 }
 0x424   : > { %v2091_v37 = vpop.f32.mrf.mxu0 }
 0x425   : > { %v1525_v50 = vmul.f32 %v2268_v14, %v2091_v37  ;;  %v2294_v37 = vpop.eup %2293 }
 0x426   : > { %v1446_v45 = vpop.f32.mrf.mxu0 }
 0x427   : > { %v1523_v24 = vmul.f32 %v2270_v12, %v1446_v45  ;;  %v1539_v49 = vpack.c.bf16 %v1525_v50, %v1524_v47  ;;  %v2296_v50 = vpop.eup %2295 }
 0x429   : > { %v1538_v30 = vpack.c.bf16 %v1523_v24, %v1522_v23 }
 0x42b   : > { %v2094_v59 = vpop.f32.mrf.mxu0  ;;  %2120 = vmatprep.mubr.bf16.mxu0 %v1538_v30  ;;  %v1708_v30 = vstv %s1707_s8 }
 0x42c   : > { %2121 = vmatmul.mubr.bf16.vlgmr.msra.gmra.mxu0 %v1539_v49  ;;  %v1528_v22 = vmul.f32 %v2280_v17, %v2094_v59 }
 0x42d   : > { %v1459_v60 = vpop.f32.mrf.mxu0 }
 0x42e   : > { %v1526_v40 = vmul.f32 %v2274_v16, %v1459_v60 }
 0x42f   : > { %v2095_v62 = vpop.f32.mrf.mxu0 }
 0x430   : > { %v1529_v38 = vmul.f32 %v2276_v63, %v2095_v62 }
 0x431   : > { %v1462_v2 = vpop.f32.mrf.mxu0 }
 0x432   : > { %v1527_v3 = vmul.f32 %v2278_v29, %v1462_v2  ;;  %v1541_v58 = vpack.c.bf16 %v1529_v38, %v1528_v22 }
 0x433   : > { %v2098_v4 = vpop.f32.mrf.mxu0 }
 0x434   : > { %v1540_v27 = vpack.c.bf16 %v1527_v3, %v1526_v40  ;;  %v1532_v61 = vmul.f32 %v2288_v43, %v2098_v4 }
 0x435   : > { %v1475_v5 = vpop.f32.mrf.mxu0 }
 0x436   : > { %2124 = vmatprep.mubr.bf16.mxu1 %v1540_v27  ;;  %v1530_v44 = vmul.f32 %v2282_v6, %v1475_v5 }
 0x437   : > { %v2099_v7 = vpop.f32.mrf.mxu0  ;;  %2125 = vmatmul.mubr.bf16.vlgmr.msra.gmra.mxu1 %v1541_v58 }
 0x438   : > { %v1533_v42 = vmul.f32 %v2284_v8, %v2099_v7 }
 0x439   : > { %v1478_v9 = vpop.f32.mrf.mxu0 }
 0x43a   : > { %v1531_v57 = vmul.f32 %v2286_v41, %v1478_v9  ;;  %v1543_v13 = vpack.c.bf16 %v1533_v42, %v1532_v61 }
 0x43b   : > { %v2102_v10 = vpop.f32.mrf.mxu0 }
 0x43c   : > { %v1542_v11 = vpack.c.bf16 %v1531_v57, %v1530_v44  ;;  %v1536_v23 = vmul.f32 %v2296_v50, %v2102_v10 }
 0x43d   : > { %v1491_v15 = vpop.f32.mrf.mxu0 }
 0x43e   : > { %2128 = vmatprep.mubr.bf16.mxu1 %v1542_v11  ;;  %v1534_v45 = vmul.f32 %v2290_v46, %v1491_v15 }
 0x43f   : > { %v2103_v48 = vpop.f32.mrf.mxu0  ;;  %2129 = vmatmul.mubr.bf16.gmra.mxu1 %v1543_v13 }
 0x440   : > { %v1537_v14 = vmul.f32 %v2292_v36, %v2103_v48 }
 0x441   : > { %v1494_v12 = vpop.f32.mrf.mxu0 }
 0x442   : > { %v1535_v0 = vmul.f32 %v2294_v37, %v1494_v12  ;;  %v1545_v47 = vpack.c.bf16 %v1537_v14, %v1536_v23 }
 0x444   : > { %v1544_v24 = vpack.c.bf16 %v1535_v0, %v1534_v45 }
 0x446   : > { %2132 = vmatprep.mubr.bf16.mxu1 %v1544_v24 }
 0x447   : > { %2133 = vmatmul.mubr.bf16.gmra.mxu1 %v1545_v47 }
 0x4ec   : > { %v2122_v31 = vpop.f32.mrf.mxu0 }
 0x4ed   : > { %v1711_v49 = vmul.f32 %v2122_v31, %v1708_v30 }
 0x4ee   : > { %v1644_v59 = vpop.f32.mrf.mxu0 }
 0x4ef   : > { %v1727_v35 = vadd.f32 %v1711_v49, %v2540_v18  ;;  %v1709_v60 = vmul.f32 %v1708_v30, %v1644_v59 }
 0x4f0   : > { %v2123_v16 = vpop.f32.mrf.mxu0 }
 0x4f1   : > { %1743 = vst.msk [vmem:[%s2419_s18 + $0x10] sm:$0xff] %vm941_vm1, %v1727_v35  ;;  %v1725_v62 = vadd.f32 %v1709_v60, %v2532_v51  ;;  %v1712_v63 = vmul.f32 %v2123_v16, %v1708_v30 }
 0x4f2   : > { %v1647_v1 = vpop.f32.mrf.mxu0 }
 0x4f3   : > { %1741 = vst.msk [vmem:[%s2419_s18] sm:$0xff] %vm941_vm1, %v1725_v62  ;;  %v1728_v29 = vadd.f32 %v1712_v63, %v2543_v19  ;;  %v1710_v38 = vmul.f32 %v1708_v30, %v1647_v1 }
 0x4f5   : > { %1744 = vst.msk [vmem:[%s2419_s18 + $0x18] sm:$0xff] %vm941_vm1, %v1728_v29  ;;  %v1726_v2 = vadd.f32 %v1710_v38, %v2535_v52 }
 0x4f7   : > { %1742 = vst.msk [vmem:[%s2419_s18 + $0x8] sm:$0xff] %vm941_vm1, %v1726_v2  ;;  %v2126_v18 = vpop.f32.mrf.mxu1 }
 0x4f8   : > { %v1715_v17 = vmul.f32 %v2126_v18, %v1708_v30 }
 0x4f9   : > { %v1660_v39 = vpop.f32.mrf.mxu1 }
 0x4fa   : > { %v1731_v51 = vadd.f32 %v1715_v17, %v2557_v25  ;;  %v1713_v40 = vmul.f32 %v1708_v30, %v1660_v39 }
 0x4fb   : > { %v2127_v3 = vpop.f32.mrf.mxu1 }
 0x4fc   : > { %1747 = vst.msk [vmem:[%s2419_s18 + $0x30] sm:$0xff] %vm941_vm1, %v1731_v51  ;;  %v1729_v19 = vadd.f32 %v1713_v40, %v2546_v20  ;;  %v1716_v22 = vmul.f32 %v2127_v3, %v1708_v30 }
 0x4fd   : > { %v1663_v4 = vpop.f32.mrf.mxu1 }
 0x4fe   : > { %1745 = vst.msk [vmem:[%s2419_s18 + $0x20] sm:$0xff] %vm941_vm1, %v1729_v19  ;;  %v1732_v52 = vadd.f32 %v1716_v22, %v2560_v26  ;;  %v1714_v27 = vmul.f32 %v1708_v30, %v1663_v4 }
 0x4ff   : > { %v2130_v58 = vpop.f32.mrf.mxu1 }
 0x500   : > { %1748 = vst.msk [vmem:[%s2419_s18 + $0x38] sm:$0xff] %vm941_vm1, %v1732_v52  ;;  %v1730_v25 = vadd.f32 %v1714_v27, %v2549_v21  ;;  %v1719_v5 = vmul.f32 %v2130_v58, %v1708_v30 }
 0x501   : > { %v1676_v6 = vpop.f32.mrf.mxu1 }
 0x502   : > { %1746 = vst.msk [vmem:[%s2419_s18 + $0x28] sm:$0xff] %vm941_vm1, %v1730_v25  ;;  %v1735_v20 = vadd.f32 %v1719_v5, %v2577_v32  ;;  %v1717_v7 = vmul.f32 %v1708_v30, %v1676_v6 }
 0x503   : > { %v2131_v8 = vpop.f32.mrf.mxu1 }
 0x504   : > { %1751 = vst.msk [vmem:[%s2419_s18 + $0x50] sm:$0xff] %vm941_vm1, %v1735_v20  ;;  %v1733_v26 = vadd.f32 %v1717_v7, %v2564_v28  ;;  %v1720_v41 = vmul.f32 %v2131_v8, %v1708_v30 }
 0x505   : > { %v1679_v42 = vpop.f32.mrf.mxu1 }
 0x506   : > { %1749 = vst.msk [vmem:[%s2419_s18 + $0x40] sm:$0xff] %vm941_vm1, %v1733_v26  ;;  %v1736_v21 = vadd.f32 %v1720_v41, %v2580_v54  ;;  %v1718_v9 = vmul.f32 %v1708_v30, %v1679_v42 }
 0x507   : > { %v2134_v43 = vpop.f32.mrf.mxu1 }
 0x508   : > { %1752 = vst.msk [vmem:[%s2419_s18 + $0x58] sm:$0xff] %vm941_vm1, %v1736_v21  ;;  %v1734_v32 = vadd.f32 %v1718_v9, %v2567_v53  ;;  %v1723_v44 = vmul.f32 %v2134_v43, %v1708_v30 }
 0x509   : > { %v1692_v57 = vpop.f32.mrf.mxu1 }
 0x50a   : > { %1750 = vst.msk [vmem:[%s2419_s18 + $0x48] sm:$0xff] %vm941_vm1, %v1734_v32  ;;  %v1739_v28 = vadd.f32 %v1723_v44, %v2595_v33  ;;  %v1721_v61 = vmul.f32 %v1708_v30, %v1692_v57 }
 0x50b   : > { %v2135_v10 = vpop.f32.mrf.mxu1 }
 0x50c   : > { %1755 = vst.msk [vmem:[%s2419_s18 + $0x70] sm:$0xff] %vm941_vm1, %v1739_v28  ;;  %v1737_v54 = vadd.f32 %v1721_v61, %v2583_v55  ;;  %v1724_v11 = vmul.f32 %v2135_v10, %v1708_v30 }
 0x50d   : > { %v1695_v13 = vpop.f32.mrf.mxu1 }
 0x50e   : > { %1753 = vst.msk [vmem:[%s2419_s18 + $0x60] sm:$0xff] %vm941_vm1, %v1737_v54  ;;  %v1740_v15 = vadd.f32 %v1724_v11, %v2598_v34  ;;  %v1722_v53 = vmul.f32 %v1708_v30, %v1695_v13 }
 0x510   : > { %1756 = vst.msk [vmem:[%s2419_s18 + $0x78] sm:$0xff] %vm941_vm1, %v1740_v15  ;;  %v1738_v46 = vadd.f32 %v1722_v53, %v2586_v56 }
 0x512   : > { %1754 = vst.msk [vmem:[%s2419_s18 + $0x68] sm:$0xff] %vm941_vm1, %v1738_v46 }
 0x513 PF: > { %s17_s27 = sadd.s32 1, %s2335_s27   ;;  %s2793_s23 = smov %s2327_s25 }
 0x514   : > { %p14_p8 = scmp.ge.s32.totalorder %s17_s27, 6   ;;  %s2794_s24 = smov %s2331_s26 }
 0x515   : > { %s2795_s25 = smov %s2798_s5  ;;  %s2796_s26 = smov %s2802_s28 }
 0x516   :  { %16 = sbr.rel (!%p14_p8) target bundleno = 3 (0x3), region = 84 }

</bundles_post_ra>
